<compile_context>
chip_gen: v7x
topology: tpu7x:2x2x1
jax: 0.10.0
libtpu: 0.0.40
codegen_flags: <defaults>
</compile_context>

<pallas_src>
import functools

import jax
import jax.numpy as jnp
from jax.experimental import pallas as pl
from jax.experimental.pallas import tpu as pltpu


def _dense_ce_kernel(logits_ref, labels_ref, out_ref, *, n_rows):
    """One batch tile: partial sum of -(labels * log_softmax(logits)).sum(-1)."""
    tm = logits_ref.shape[0]

    x = logits_ref[...].astype(jnp.float32)   # (TM, C)
    y = labels_ref[...].astype(jnp.float32)   # (TM, C)

    # Numerically-stable logsumexp pieces (lane reductions only).
    m = jnp.max(x, axis=-1, keepdims=True)                                # (TM, 1)
    lse = jnp.log(jnp.sum(jnp.exp(x - m), axis=-1, keepdims=True))        # (TM, 1)

    # Direct, well-conditioned form of -(y * log_softmax(x)).sum(-1):
    #   row_loss = sum_j y_j * ((m + lse) - x_j)
    row_loss = jnp.sum(y * ((m + lse) - x), axis=-1, keepdims=True)       # (TM, 1)

    # Mask rows past the true batch (ragged last tile reads unspecified data
    # in its out-of-range region; where() keeps any NaN/inf from reaching the
    # partial sum).
    row0 = pl.program_id(0) * tm
    rid = jax.lax.broadcasted_iota(jnp.int32, (tm, 1), 0) + row0
    row_loss = jnp.where(rid < n_rows, row_loss, 0.0)

    tile_total = jnp.sum(row_loss)

    # Lane-dense (1,1,128) output block: partial sum in lane 0, zeros elsewhere,
    # so the wrapper can simply jnp.sum the whole partials array.
    lane = jax.lax.broadcasted_iota(jnp.int32, out_ref.shape, 2)
    out_ref[...] = jnp.where(lane == 0, tile_total, 0.0)


def _round_up(x, m):
    return ((x + m - 1) // m) * m


def dense_cross_entropy(logits, labels, *, tile_rows=None):
    """Equivalent of DenseCrossEntropy().forward(logits, labels) -> f32 scalar."""
    assert logits.shape == labels.shape and logits.ndim == 2
    n, c = logits.shape
    isz_lg = jnp.dtype(logits.dtype).itemsize
    isz_lb = jnp.dtype(labels.dtype).itemsize

    # VMEM lane padding of the in-VMEM block layout (HBM traffic stays n*c).
    c_lanes = _round_up(c, 128)

    # Chip-aware VMEM budget: v5e/v6e have 128 MiB physical VMEM, v7x only
    # 64 MiB per TensorCore.
    try:
        phys_vmem = int(getattr(pltpu.get_tpu_info(), "vmem_capacity_bytes",
                                64 * 1024 * 1024))
    except Exception:  # pragma: no cover - non-TPU / interpret fallback
        phys_vmem = 64 * 1024 * 1024
    if phys_vmem >= 96 * 1024 * 1024:          # v5e / v6e
        budget, vmem_limit = 40 * 1024 * 1024, 64 * 1024 * 1024
    else:                                      # v7x
        budget, vmem_limit = 20 * 1024 * 1024, 40 * 1024 * 1024

    # Per-row VMEM estimate: 2 pipeline buffers per input (both dtypes counted,
    # lane-padded layout) + ~4 f32 element-wise temporaries live in the body
    # (x_f32, y_f32, exp(x-m), y*((m+lse)-x)).
    per_row_vmem = 2 * c_lanes * (isz_lg + isz_lb) + 4 * c_lanes * 4

    if tile_rows is None:
        tile_rows = max(8, (budget // per_row_vmem) // 8 * 8)
    else:
        tile_rows = max(8, _round_up(tile_rows, 8))
    # Don't tile past the batch.
    tile_rows = min(tile_rows, _round_up(n, 8))
    # Give the grid at least 2 steps when the batch allows it so the
    # "parallel" axis can be split across v7x's two TensorCores.
    if n >= 16 and pl.cdiv(n, tile_rows) < 2:
        tile_rows = max(8, _round_up(pl.cdiv(n, 2), 8))
    num_tiles = pl.cdiv(n, tile_rows)

    kernel = functools.partial(_dense_ce_kernel, n_rows=n)

    partials = pl.pallas_call(
        kernel,
        out_shape=jax.ShapeDtypeStruct((num_tiles, 1, 128), jnp.float32),
        grid_spec=pltpu.PrefetchScalarGridSpec(
            num_scalar_prefetch=0,
            grid=(num_tiles,),
            in_specs=[
                pl.BlockSpec((tile_rows, c), lambda i: (i, 0)),
                pl.BlockSpec((tile_rows, c), lambda i: (i, 0)),
            ],
            out_specs=pl.BlockSpec((1, 1, 128), lambda i: (i, 0, 0)),
        ),
        compiler_params=pltpu.CompilerParams(
            dimension_semantics=("parallel",),
            vmem_limit_bytes=vmem_limit,
        ),
    )(logits, labels)

    # Per-tile partial sums (lane 0 only, rest zeros) -> mean over true batch.
    return jnp.sum(partials) / jnp.float32(n)


def _reference(logits, labels):
    logits = logits.astype(jnp.float32)
    labels = labels.astype(jnp.float32)
    log_probs = jax.nn.log_softmax(logits, axis=-1)
    return jnp.mean(jnp.sum(-labels * log_probs, axis=-1))


if __name__ == "__main__":
    key = jax.random.PRNGKey(0)
    k1, k2, k3, k4, k5, k6 = jax.random.split(key, 6)

    # Shapes consistent with the module (Plant Pathology: 4 classes).
    N, C = 16, 4
    logits = jax.random.normal(k1, (N, C), dtype=jnp.float32) * 2.0
    # soft labels (rows sum to 1), like dense one-hot / mixup targets
    labels = jax.nn.softmax(jax.random.normal(k2, (N, C), dtype=jnp.float32),
                            axis=-1)
    loss = jax.block_until_ready(dense_cross_entropy(logits, labels))
    ref = _reference(logits, labels)
    assert jnp.allclose(loss, ref, rtol=1e-5, atol=1e-5), (loss, ref)

    # Ragged batch / odd class count -> exercises the in-kernel row masking
    # and the non-128 lane width path.
    N2, C2 = 20, 7
    logits2 = jax.random.normal(k3, (N2, C2), dtype=jnp.float32) * 3.0
    labels2 = jax.nn.softmax(jax.random.normal(k4, (N2, C2), dtype=jnp.float32),
                             axis=-1)
    loss2 = jax.block_until_ready(dense_cross_entropy(logits2, labels2))
    ref2 = _reference(logits2, labels2)
    assert jnp.allclose(loss2, ref2, rtol=1e-5, atol=1e-5), (loss2, ref2)

    # Tiny batch (block rows > batch) in bf16: halves HBM traffic, f32 accum.
    N3, C3 = 4, 4
    logits3 = (jax.random.normal(k5, (N3, C3), dtype=jnp.float32) * 2.0
               ).astype(jnp.bfloat16)
    labels3 = jax.nn.softmax(jax.random.normal(k6, (N3, C3), dtype=jnp.float32),
                             axis=-1).astype(jnp.bfloat16)
    loss3 = jax.block_until_ready(dense_cross_entropy(logits3, labels3))
    ref3 = _reference(logits3, labels3)
    assert jnp.allclose(loss3, ref3, rtol=1e-4, atol=1e-4), (loss3, ref3)

    print("KERNEL_OK")
</pallas_src>

<mosaic_0001>
module attributes {stable_mosaic.version = 11 : i64} {
  func.func @_dense_ce_kernel(%arg0: i32, %arg1: memref<8x4xf32, #tpu.memory_space<vmem>>, %arg2: memref<8x4xf32, #tpu.memory_space<vmem>>, %arg3: memref<1x1x128xf32, #tpu.memory_space<vmem>>) attributes {dimension_semantics = [#tpu.dimension_semantics<parallel>], iteration_bounds = array<i64: 2>, scalar_prefetch = 0 : i64, scratch_operands = 0 : i64, tpu.core_type = #tpu.core_type<tc>, window_params = [{transform_indices = @transform_0, window_bounds = array<i64: 8, 4>}, {transform_indices = @transform_1, window_bounds = array<i64: 8, 4>}, {transform_indices = @transform_2, window_bounds = array<i64: 1, 1, 128>}]} {
    %c0 = arith.constant 0 : index
    %c0_0 = arith.constant 0 : index
    %0 = vector.load %arg1[%c0, %c0_0] : memref<8x4xf32, #tpu.memory_space<vmem>>, vector<8x4xf32>
    %c0_1 = arith.constant 0 : index
    %c0_2 = arith.constant 0 : index
    %1 = vector.load %arg2[%c0_1, %c0_2] : memref<8x4xf32, #tpu.memory_space<vmem>>, vector<8x4xf32>
    %cst = arith.constant dense<0xFF800000> : vector<8xf32>
    %2 = vector.multi_reduction <maximumf>, %0, %cst [1] : vector<8x4xf32> to vector<8xf32>
    %3 = vector.shape_cast %2 : vector<8xf32> to vector<8x1xf32>
    %4 = vector.broadcast %3 : vector<8x1xf32> to vector<8x4xf32>
    %5 = arith.subf %0, %4 : vector<8x4xf32>
    %6 = math.exp %5 : vector<8x4xf32>
    %cst_3 = arith.constant dense<0.000000e+00> : vector<8xf32>
    %7 = vector.multi_reduction <add>, %6, %cst_3 [1] : vector<8x4xf32> to vector<8xf32>
    %8 = vector.shape_cast %7 : vector<8xf32> to vector<8x1xf32>
    %9 = math.log %8 : vector<8x1xf32>
    %10 = arith.addf %3, %9 : vector<8x1xf32>
    %11 = vector.broadcast %10 : vector<8x1xf32> to vector<8x4xf32>
    %12 = arith.subf %11, %0 : vector<8x4xf32>
    %13 = arith.mulf %1, %12 : vector<8x4xf32>
    %cst_4 = arith.constant dense<0.000000e+00> : vector<8xf32>
    %14 = vector.multi_reduction <add>, %13, %cst_4 [1] : vector<8x4xf32> to vector<8xf32>
    %15 = vector.shape_cast %14 : vector<8xf32> to vector<8x1xf32>
    %c8_i32 = arith.constant 8 : i32
    %16 = arith.muli %arg0, %c8_i32 : i32
    %17 = tpu.iota {dimensions = array<i32: 0>} : vector<8x1xi32>
    %18 = vector.broadcast %16 : i32 to vector<8x1xi32>
    %19 = arith.addi %17, %18 : vector<8x1xi32>
    %c16_i32 = arith.constant 16 : i32
    %20 = vector.broadcast %c16_i32 : i32 to vector<8x1xi32>
    %21 = arith.cmpi slt, %19, %20 : vector<8x1xi32>
    %cst_5 = arith.constant 0.000000e+00 : f32
    %22 = vector.broadcast %cst_5 : f32 to vector<8x1xf32>
    %23 = arith.select %21, %15, %22 : vector<8x1xi1>, vector<8x1xf32>
    %24 = vector.shape_cast %23 : vector<8x1xf32> to vector<1x8x1xf32>
    %cst_6 = arith.constant dense<0.000000e+00> : vector<1xf32>
    %25 = vector.multi_reduction <add>, %24, %cst_6 [1, 2] : vector<1x8x1xf32> to vector<1xf32>
    %26 = vector.shape_cast %25 : vector<1xf32> to vector<1x1x1xf32>
    %27 = vector.extract %26[0, 0, 0] : f32 from vector<1x1x1xf32>
    %28 = tpu.iota {dimensions = array<i32: 2>} : vector<1x1x128xi32>
    %c0_i32 = arith.constant 0 : i32
    %29 = vector.broadcast %c0_i32 : i32 to vector<1x1x128xi32>
    %30 = arith.cmpi eq, %28, %29 : vector<1x1x128xi32>
    %cst_7 = arith.constant 0.000000e+00 : f32
    %31 = vector.broadcast %27 : f32 to vector<1x1x128xf32>
    %32 = vector.broadcast %cst_7 : f32 to vector<1x1x128xf32>
    %33 = arith.select %30, %31, %32 : vector<1x1x128xi1>, vector<1x1x128xf32>
    %c0_8 = arith.constant 0 : index
    %c0_9 = arith.constant 0 : index
    %c0_10 = arith.constant 0 : index
    %34 = vector.load %arg3[%c0_8, %c0_9, %c0_10] : memref<1x1x128xf32, #tpu.memory_space<vmem>>, vector<1x1x128xf32>
    tpu.vector_store %arg3[%c0_8, %c0_9, %c0_10], %33 {strides = array<i32>} : memref<1x1x128xf32, #tpu.memory_space<vmem>>, vector<1x1x128xf32>,
    return
  }
  func.func @transform_0(%arg0: i32) -> (i32, i32) {
    %c0_i32 = arith.constant 0 : i32
    %c0_i32_0 = arith.constant 0 : i32
    return %arg0, %c0_i32 : i32, i32
  }
  func.func @transform_1(%arg0: i32) -> (i32, i32) {
    %c0_i32 = arith.constant 0 : i32
    %c0_i32_0 = arith.constant 0 : i32
    return %arg0, %c0_i32 : i32, i32
  }
  func.func @transform_2(%arg0: i32) -> (i32, i32, i32) {
    %c0_i32 = arith.constant 0 : i32
    %c0_i32_0 = arith.constant 0 : i32
    %c0_i32_1 = arith.constant 0 : i32
    return %arg0, %c0_i32, %c0_i32_0 : i32, i32, i32
  }
}

</mosaic_0001>

<bundles_post_ra>
// kernel: tpu_custom_call.1
= control target key start
LH: loop header
LB: loop body
LE: loop exit
PB: predicated region body
PF: predicated region fallthrough
CT: control target
= control target key end

     0   :  { %7 = vsyncpa [#allocation3], 0  ;;  %s521_s0 = inlined_call_operand.vmem [shape: f32[16,4], index: 0, kind: input, shape index: {}]   ;;  %s522_s1 = inlined_call_operand.vmem [shape: f32[16,4], index: 1, kind: input, shape index: {}]   ;;  %s523_s2 = inlined_call_operand.hbm [shape: f32[2,1,128], index: 2, kind: output, shape index: {}]  }
   0x1   :  { %9 = vsyncpa [#allocation3 + $0x1], 0  ;;  %s414_s9 = smov 0   ;;  %s416_s10 = smov 0  }
   0x2   :  { %s418_s11 = smov 0   ;;  %s420_s12 = smov 0  }
   0x3 LB: > { %s435_s13 = sadd.s32 4294967295, %s396_s12   ;;  %s279_s14 = sadd.s32 4294967294, %s396_s12   ;;  %s396_s12 = sphi %s420_s12, %s529_s12   ;;  %s392_s11 = sphi %s418_s11, %s528_s11   ;;  %s388_s10 = sphi %s416_s10, %s527_s10   ;;  %s384_s9 = sphi %s414_s9, %s526_s9  }
   0x4   : > { %s439_s15 = sadd.s32 1, %s396_s12   ;;  %s74_s16 = sadd.s32 1, %s392_s11 }
   0x5   : > { %s71_s17 = ssub.s32 %s396_s12, %s439_s15  ;;  %p84_p0 = scmp.ne.s32.totalorder %s392_s11, %s388_s10 }
   0x6   : > { %p72_p1 = scmp.eq.s32.totalorder %s71_s17, 0  ;;  %p85_p2 = scmp.eq.s32.totalorder %s435_s13, 1 }
   0x7   : > { %p90_p3 = scmp.ne.s32.totalorder %s388_s10, %s384_s9  ;;  %p91_p4 = scmp.eq.s32.totalorder %s279_s14, 1 }
   0x8   : > { %s450_s18 = scalar_select %p72_p1, %s392_s11, %s74_s16  }
   0x9   : > { %p452_p5 = por %p85_p2, %p84_p0  ;;  %p456_p6 = por %p91_p4, %p90_p3 }
   0xa   : > { %p282_p7 = scmp.ge.s32.totalorder %s396_s12, 1  ;;  %p123_p8 = scmp.lt.s32.totalorder %s396_s12, 3 }
   0xc   : > { %p124_p9 = pnand %p282_p7, %p123_p8 }
   0xd   : > { %p147_p10 = scmp.lt.s32.totalorder (!%p124_p9), %s435_s13, 1  ;;  %vm157_vm0 = vcmask (!%p124_p9), 31744   ;;  %v176_v15 = vlaneseq (!%p124_p9)  ;;  %s285_s29 = sshll.u32 (!%p124_p9), %s435_s13, 3  ;;  %vm182_vm2 = vcmask (!%p124_p9), 7168  }
   0xe   : > { %127 = sbr.rel (%p124_p9) target bundleno = 711 (0x2c7), region = 28  ;;  %v178_v17 = vstv (!%p124_p9), %s285_s29  ;;  %s145_s30 = sand.u32 (!%p124_p9), 1, %s388_s10  }
   0xf   : > { %v177_v16 = vshrl.u32 (!%p124_p9), %v176_v15, 7  ;;  %v194_v29 = vand.u32 (!%p124_p9), 127, %v176_v15  ;;  %s286_s3 = sshll.u32 (!%p124_p9), %s435_s13, 4  ;;  %s146_s4 = scalar_lea.vmem (!%p124_p9), [#allocation2], %s145_s30 }
  0x10   : > { %s212_s5 = sshll.u32 (!%p124_p9), %s146_s4, 4  ;;  %s479_s14 = scalar_lea.hbm (!%p124_p9), %s523_s2, %s286_s3  ;;  %s481_s5 = int_to_ptr.vmem [resolvable:$true] %s212_s5 }
  0x11   : > { %v179_v18 = vadd.s32 (!%p124_p9), %v178_v17, %v177_v16  ;;  %vm195_vm3 = vcmp.eq.s32.totalorder (!%p124_p9), %v194_v29, 0  ;;  %s200_s16 = scalar_lea.sflag (!%p124_p9), [#allocation3], %s145_s30  ;;  %s334_s17 = scalar_lea.vmem (!%p124_p9), %s481_s5, 16 }
  0x12   : > { %p335_p11 = scmp.ne.s32.totalorder (!%p124_p9), %s481_s5, %s334_s17 }
  0x13   : > { %vm180_vm1 = vcmp.lt.s32.totalorder (!%p124_p9), %v179_v18, 16 }
  0x14   : > { %p336_p12 = pnand (!%p124_p9), %p335_p11, %p452_p5 }
  0x15   : > { %s148_s21 = scalar_select %p147_p10, %s435_s13, 1 }
  0x16   : > { %p337_p13 = pneg %p336_p12  ;;  %s398_s13 = smov [#allocation2]  }
  0x17   : > { %s283_s22 = sshll.u32 %s148_s21, 3  ;;  %s338_s21 = sshll.u32 %s398_s13, 4  ;;  %s339_s21 = int_to_ptr.vmem [resolvable:$false] %s338_s21 }
  0x18   : > { %s150_s25 = scalar_lea.vmem %s521_s0, %s283_s22  ;;  %s154_s28 = scalar_lea.vmem %s522_s1, %s283_s22 }
  0x19   : > { %v155_v0 = vld [vmem:[%s150_s25] sm:$0xff]  ;;  %s340_s22 = scalar_lea.vmem %s339_s21, 32  ;;  %p341_p0 = scmp.lt.s32.totalorder %s481_s5, %s339_s21 }
  0x1a   : > { %v158_v1 = vsel %vm157_vm0, %v155_v0, -inf  ;;  %v156_v11 = vld [vmem:[%s154_s28] sm:$0xff]  ;;  %p342_p1 = scmp.lt.s32.totalorder %s340_s22, %s334_s17 }
  0x1b   : > { %159 = vmax.xlane.f32.xlu0 %v158_v1 }
  0x1c   : > { %p343_p2 = por %p342_p1, %p341_p0 }
  0x1e   : > { %p344_p3 = pnand %p343_p2, %p337_p13 }
  0xa8   : > { %v160_v2 = vpop.xlane.xlu0 %159 }
  0xa9   : > { %v161_v3 = vsub.f32 %v155_v0, %v160_v2 }
  0xab   : > { %v162_v4 = vmul.f32 1.442695, %v161_v3 }
  0xad   : > { %330 = vpow2.f32 %v162_v4 }
  0xb7   : > { %v331_v5 = vpop.eup %330 }
  0xb8   : > { %v164_v6 = vsel %vm157_vm0, %v331_v5, 0.0 }
  0xb9   : > { %165 = vadd.xlane.f32.xlu0 %v164_v6 }
 0x146   : > { %v166_v7 = vpop.xlane.xlu0 %165 }
 0x147   : > { %332 = vlog2.f32 %v166_v7 }
 0x151   : > { %v333_v8 = vpop.eup %332 }
 0x152   : > { %v168_v9 = vmul.f32 0.6931472, %v333_v8 }
 0x154   : > { %v169_v10 = vadd.f32 %v168_v9, %v160_v2 }
 0x156   : > { %v170_v12 = vsub.f32 %v169_v10, %v155_v0 }
 0x158   : > { %v171_v13 = vmul.f32 %v170_v12, %v156_v11 }
 0x15a   : > { %v172_v14 = vsel %vm157_vm0, %v171_v13, 0.0 }
 0x15b   : > { %173 = vadd.xlane.f32.xlu1 %v172_v14 }
 0x1e8   : > { %v174_v19 = vpop.xlane.xlu1 %173 }
 0x1e9   : > { %v181_v20 = vsel %vm180_vm1, %v174_v19, 0.0 }
 0x1ea   : > { %v183_v21 = vsel %vm182_vm2, %v181_v20, 0.0 }
 0x1eb   : > { %184 = vadd.xlane.f32.xlu1 %v183_v21 }
 0x278   : > { %v185_v22 = vpop.xlane.xlu1 %184 }
 0x279   : > { %v186_v23 = vrot.slane %v185_v22, 4 }
 0x27b   : > { %v187_v24 = vadd.f32 %v186_v23, %v185_v22 }
 0x27d   : > { %v188_v25 = vrot.slane %v187_v24, 2 }
 0x27f   : > { %v189_v26 = vadd.f32 %v188_v25, %v187_v24 }
 0x281   : > { %v190_v27 = vrot.slane %v189_v26, 1 }
 0x283   : > { %v191_v28 = vadd.f32 %v190_v27, %v189_v26 }
 0x285   : > { %289 = vpush %v191_v28 }
 0x2b6   : > { %s290_s6 = spop %289 }
 0x2b7   : > { %v196_v30 = vstv %s290_s6 }
 0x2b8   : > { %v197_v31 = vsel %vm195_vm3, %v196_v30, 0.0 }
 0x2b9   : > { %198 = vst [vmem:[%s146_s4] sm:$0x1] %v197_v31 }
 0x2ba   : > { %347 = shalt.err (!%p344_p3)
}
 0x2bb   : > { %s348_s23 = scalar_lea.hbm %s479_s14, 16  ;;  %s352_s26 = scalar_lea.hbm %s523_s2, 32 }
 0x2bc   : > { %p349_p4 = scmp.ne.s32.totalorder %s479_s14, %s348_s23  ;;  %p353_p9 = scmp.lt.u32.totalorder %s479_s14, %s523_s2 }
 0x2bd   : > { %p354_p10 = scmp.lt.u32.totalorder %s352_s26, %s348_s23  ;;  %p356_p12 = scmp.lt.u32.totalorder %s348_s23, %s479_s14 }
 0x2be   : > { %p350_p7 = pnand %p349_p4, %p452_p5 }
 0x2bf   : > { %p355_p11 = por %p354_p10, %p353_p9 }
 0x2c0   : > { %p351_p8 = pneg %p350_p7 }
 0x2c1   : > { %p357_p13 = por %p356_p12, %p355_p11 }
 0x2c3   : > { %p358_p0 = pnand %p357_p13, %p351_p8 }
 0x2c5   : > { %361 = shalt.err (!%p358_p0)
}
 0x2c6   : > { %291 = dma.vmem_to_hbm [thread:$0]  (%p452_p5), %s481_s5, 16, %s479_s14, %s200_s16  }
 0x2c7 PF: > { %p297_p1 = scmp.ge.s32.totalorder %s396_s12, 2  ;;  %s224_s29 = sand.u32 1, %s384_s9  }
 0x2c8   : > { %s225_s30 = scalar_lea.sflag [#allocation3], %s224_s29 }
 0x2c9   : > { %p294_p2 = pnand %p297_p1, %p456_p6 }
 0x2cb   : > { %379 = dma.done.wait (!%p294_p2), %s225_s30, 16  }
 0x2cc   : > { %381 = vsyncadd (!%p294_p2), %s225_s30, 4294967280  ;;  %p12_p3 = scmp.ge.s32.totalorder %s439_s15, 4   ;;  %s526_s9 = smov %s388_s10 }
 0x2cd   : > { %s527_s10 = smov %s392_s11  ;;  %s528_s11 = smov %s450_s18 }
 0x2ce   : > { %s529_s12 = smov %s439_s15  ;;  %14 = sbr.rel (!%p12_p3) target bundleno = 3 (0x3), region = 66 }
 0x2d5   :  { %229 = vsyncpa [#allocation3], 1 }
 0x2d6   :  { %231 = vsyncpa [#allocation3 + $0x1], 1 }

</bundles_post_ra>
